<compile_context>
chip_gen: v7x
topology: tpu7x:2x2x1
jax: 0.10.0
libtpu: 0.0.40
codegen_flags: <defaults>
</compile_context>

<pallas_src>
import jax
import jax.numpy as jnp
from jax.experimental import pallas as pl
from jax.experimental.pallas import tpu as pltpu

LANES = 128


def _mm_classifier_kernel(img_ref, txt_ref,
                          wf_img_ref, wf_txt_ref, bf_ref,
                          w1_ref, b1_ref,
                          w2_ref, b2_ref,
                          out_ref):
    """One batch tile: out = fc2(relu(fc1(relu(fusion(cat(relu(img), relu(txt)))))))."""
    cdt = wf_img_ref.dtype  # MXU compute dtype (bf16); accumulation stays f32.

    # img_feat = relu(image_embedding); text_feat = relu(text_embedding)
    # ReLU runs on the VPU in f32; only MXU operands are cast to bf16.
    img = jnp.maximum(img_ref[...], 0.0).astype(cdt)
    txt = jnp.maximum(txt_ref[...], 0.0).astype(cdt)

    # fused = relu(Linear(concat(img, txt)))   (dropout == identity in eval mode)
    fused = (
        jnp.dot(img, wf_img_ref[...], preferred_element_type=jnp.float32)
        + jnp.dot(txt, wf_txt_ref[...], preferred_element_type=jnp.float32)
        + bf_ref[...]
    )
    fused = jnp.maximum(fused, 0.0).astype(cdt)

    # hidden = relu(fc1(fused))
    hidden = jnp.dot(fused, w1_ref[...], preferred_element_type=jnp.float32) + b1_ref[...]
    hidden = jnp.maximum(hidden, 0.0).astype(cdt)

    # out = fc2(hidden)   (class dim zero-padded to a full 128-lane width)
    out = jnp.dot(hidden, w2_ref[...], preferred_element_type=jnp.float32) + b2_ref[...]
    out_ref[...] = out.astype(out_ref.dtype)


def prepare_params(params, image_dim, compute_dtype=jnp.bfloat16):
    """One-time weight preprocessing -- keep OUT of the per-call hot path.

    params (PyTorch [out_features, in_features] layout):
      W_fusion [H, Di+Dt], b_fusion [H], W1 [H, F], b1 [H], W2 [C, H], b2 [C]
    Returns dict of kernel-ready arrays: [in, out] weights (bf16), f32 biases,
    fusion weight split along the concat axis, class dim padded to 128 lanes.
    """
    H = params["W_fusion"].shape[0]
    C = params["W2"].shape[0]
    Cp = ((C + LANES - 1) // LANES) * LANES  # lane-dense output width

    wf_t = params["W_fusion"].T.astype(compute_dtype)        # [Di+Dt, H]
    wf_img = wf_t[:image_dim, :]                             # [Di, H]
    wf_txt = wf_t[image_dim:, :]                             # [Dt, H]
    bf = params["b_fusion"].astype(jnp.float32).reshape(1, H)
    w1 = params["W1"].T.astype(compute_dtype)                # [F, H]
    b1 = params["b1"].astype(jnp.float32).reshape(1, H)
    w2 = jnp.pad(params["W2"].T.astype(compute_dtype), ((0, 0), (0, Cp - C)))  # [H, Cp]
    b2 = jnp.pad(params["b2"].astype(jnp.float32), (0, Cp - C)).reshape(1, Cp)

    prep = {
        "wf_img": wf_img, "wf_txt": wf_txt, "bf": bf,
        "w1": w1, "b1": b1, "w2": w2, "b2": b2,
        "num_classes": C,
    }
    return prep


def multi_modal_classifier_forward(image_embedding, text_embedding, prep, *,
                                   block_b=512):
    """Forward pass using the Pallas kernel. `prep` comes from prepare_params()."""
    B, Di = image_embedding.shape
    _, Dt = text_embedding.shape
    H = prep["wf_img"].shape[1]
    F = prep["w1"].shape[0]
    Cp = prep["w2"].shape[1]
    C = prep["num_classes"]

    TB = min(block_b, B)                 # batch tile (rows); weights stay resident
    grid = (pl.cdiv(B, TB),)

    batch_tile = lambda i: (i, 0)        # tiled along batch
    resident = lambda i: (0, 0)          # same block every step -> DMA'd once

    # Advisory cost estimate so XLA schedules the custom call sensibly.
    wdt_bytes = jnp.dtype(prep["wf_img"].dtype).itemsize
    act_bytes = jnp.dtype(image_embedding.dtype).itemsize
    cost = pl.CostEstimate(
        flops=2 * B * (Di * H + Dt * H + F * H + H * Cp),
        transcendentals=0,
        bytes_accessed=int(
            (Di * H + Dt * H + F * H + H * Cp) * wdt_bytes
            + B * (Di + Dt) * act_bytes
            + B * Cp * 4
        ),
    )

    out_padded = pl.pallas_call(
        _mm_classifier_kernel,
        out_shape=jax.ShapeDtypeStruct((B, Cp), jnp.float32),
        grid=grid,
        in_specs=[
            pl.BlockSpec((TB, Di), batch_tile),        # image embedding tile
            pl.BlockSpec((TB, Dt), batch_tile),        # text embedding tile
            pl.BlockSpec((Di, H), resident),           # fusion weight (img half)
            pl.BlockSpec((Dt, H), resident),           # fusion weight (text half)
            pl.BlockSpec((1, H), resident),            # fusion bias
            pl.BlockSpec((F, H), resident),            # fc1 weight
            pl.BlockSpec((1, H), resident),            # fc1 bias
            pl.BlockSpec((H, Cp), resident),           # fc2 weight (class-padded)
            pl.BlockSpec((1, Cp), resident),           # fc2 bias (class-padded)
        ],
        out_specs=pl.BlockSpec((TB, Cp), batch_tile),
        compiler_params=pltpu.CompilerParams(
            dimension_semantics=("parallel",)),        # shard batch tiles over 2 TCs on v7x
        cost_estimate=cost,
    )(image_embedding, text_embedding,
      prep["wf_img"], prep["wf_txt"], prep["bf"],
      prep["w1"], prep["b1"], prep["w2"], prep["b2"])

    # Strip the lane padding (kernel stores a lane-dense (TB, 128) slab).
    return out_padded[:, :C]


def _reference_forward(image_embedding, text_embedding, params):
    """Pure-JAX f32 reference matching the PyTorch module (eval mode)."""
    img = jnp.maximum(image_embedding, 0.0)
    txt = jnp.maximum(text_embedding, 0.0)
    combined = jnp.concatenate([img, txt], axis=1)
    fused = jnp.maximum(combined @ params["W_fusion"].T + params["b_fusion"], 0.0)
    hidden = jnp.maximum(fused @ params["W1"].T + params["b1"], 0.0)
    return hidden @ params["W2"].T + params["b2"]


if __name__ == "__main__":
    # Small shapes consistent with the module's forward (hidden_dim == fusion_output_size).
    B = 256
    IMAGE_DIM = 128
    TEXT_DIM = 256
    HIDDEN = 128
    NUM_CLASSES = 2
    BLOCK_B = 128          # -> grid=(2,): exercises the batch-tiled pipeline

    key = jax.random.PRNGKey(0)
    k = jax.random.split(key, 8)

    image_embedding = jax.random.normal(k[0], (B, IMAGE_DIM), dtype=jnp.float32)
    text_embedding = jax.random.normal(k[1], (B, TEXT_DIM), dtype=jnp.float32)

    # Deterministic parameter init (PyTorch [out_features, in_features] layout).
    params = {
        "W_fusion": 0.02 * jax.random.normal(k[2], (HIDDEN, IMAGE_DIM + TEXT_DIM), jnp.float32),
        "b_fusion": 0.01 * jax.random.normal(k[3], (HIDDEN,), jnp.float32),
        "W1": 0.02 * jax.random.normal(k[4], (HIDDEN, HIDDEN), jnp.float32),
        "b1": 0.01 * jax.random.normal(k[5], (HIDDEN,), jnp.float32),
        "W2": 0.02 * jax.random.normal(k[6], (NUM_CLASSES, HIDDEN), jnp.float32),
        "b2": 0.01 * jax.random.normal(k[7], (NUM_CLASSES,), jnp.float32),
    }

    # One-time preprocessing (transpose/split/pad/bf16 cast), outside the hot path.
    prep = prepare_params(params, image_dim=IMAGE_DIM, compute_dtype=jnp.bfloat16)
    prep = {kk: (jax.block_until_ready(v) if isinstance(v, jax.Array) else v)
            for kk, v in prep.items()}

    out = multi_modal_classifier_forward(image_embedding, text_embedding, prep,
                                         block_b=BLOCK_B)
    out = jax.block_until_ready(out)

    ref = _reference_forward(image_embedding, text_embedding, params)
    assert out.shape == (B, NUM_CLASSES)
    # bf16 MXU operands vs f32 reference -> relaxed tolerance.
    assert jnp.allclose(out, ref, atol=2e-2, rtol=2e-2), "mismatch vs reference"

    print("KERNEL_OK")
</pallas_src>

<mosaic_0001>
module attributes {stable_mosaic.version = 11 : i64} {
  func.func @_mm_classifier_kernel(%arg0: i32, %arg1: memref<128x128xf32, #tpu.memory_space<vmem>>, %arg2: memref<128x256xf32, #tpu.memory_space<vmem>>, %arg3: memref<128x128xbf16, #tpu.memory_space<vmem>>, %arg4: memref<256x128xbf16, #tpu.memory_space<vmem>>, %arg5: memref<1x128xf32, #tpu.memory_space<vmem>>, %arg6: memref<128x128xbf16, #tpu.memory_space<vmem>>, %arg7: memref<1x128xf32, #tpu.memory_space<vmem>>, %arg8: memref<128x128xbf16, #tpu.memory_space<vmem>>, %arg9: memref<1x128xf32, #tpu.memory_space<vmem>>, %arg10: memref<128x128xf32, #tpu.memory_space<vmem>>) attributes {dimension_semantics = [#tpu.dimension_semantics<parallel>], iteration_bounds = array<i64: 2>, scalar_prefetch = 0 : i64, scratch_operands = 0 : i64, tpu.core_type = #tpu.core_type<tc>, window_params = [{transform_indices = @transform_0, window_bounds = array<i64: 128, 128>}, {transform_indices = @transform_1, window_bounds = array<i64: 128, 256>}, {pipeline_mode = #tpu.pipeline_mode<synchronous>, transform_indices = @transform_2, window_bounds = array<i64: 128, 128>}, {pipeline_mode = #tpu.pipeline_mode<synchronous>, transform_indices = @transform_3, window_bounds = array<i64: 256, 128>}, {pipeline_mode = #tpu.pipeline_mode<synchronous>, transform_indices = @transform_4, window_bounds = array<i64: 1, 128>}, {pipeline_mode = #tpu.pipeline_mode<synchronous>, transform_indices = @transform_5, window_bounds = array<i64: 128, 128>}, {pipeline_mode = #tpu.pipeline_mode<synchronous>, transform_indices = @transform_6, window_bounds = array<i64: 1, 128>}, {pipeline_mode = #tpu.pipeline_mode<synchronous>, transform_indices = @transform_7, window_bounds = array<i64: 128, 128>}, {pipeline_mode = #tpu.pipeline_mode<synchronous>, transform_indices = @transform_8, window_bounds = array<i64: 1, 128>}, {transform_indices = @transform_9, window_bounds = array<i64: 128, 128>}]} {
    %c0 = arith.constant 0 : index
    %c0_0 = arith.constant 0 : index
    %0 = vector.load %arg1[%c0, %c0_0] : memref<128x128xf32, #tpu.memory_space<vmem>>, vector<128x128xf32>
    %cst = arith.constant 0.000000e+00 : f32
    %1 = vector.broadcast %cst : f32 to vector<128x128xf32>
    %2 = arith.maximumf %0, %1 : vector<128x128xf32>
    %3 = arith.truncf %2 : vector<128x128xf32> to vector<128x128xbf16>
    %c0_1 = arith.constant 0 : index
    %c0_2 = arith.constant 0 : index
    %4 = vector.load %arg2[%c0_1, %c0_2] : memref<128x256xf32, #tpu.memory_space<vmem>>, vector<128x256xf32>
    %cst_3 = arith.constant 0.000000e+00 : f32
    %5 = vector.broadcast %cst_3 : f32 to vector<128x256xf32>
    %6 = arith.maximumf %4, %5 : vector<128x256xf32>
    %7 = arith.truncf %6 : vector<128x256xf32> to vector<128x256xbf16>
    %c0_4 = arith.constant 0 : index
    %c0_5 = arith.constant 0 : index
    %8 = vector.load %arg3[%c0_4, %c0_5] : memref<128x128xbf16, #tpu.memory_space<vmem>>, vector<128x128xbf16>
    %cst_6 = arith.constant dense<0.000000e+00> : vector<128x128xf32>
    %9 = tpu.matmul %3, %8, %cst_6 {dimension_numbers = #tpu.dot_dimension_numbers<[1], [0], [0], [1], [0, 0, 1, 1], [], []>} : vector<128x128xbf16>, vector<128x128xbf16>, vector<128x128xf32> -> vector<128x128xf32>
    %c0_7 = arith.constant 0 : index
    %c0_8 = arith.constant 0 : index
    %10 = vector.load %arg4[%c0_7, %c0_8] : memref<256x128xbf16, #tpu.memory_space<vmem>>, vector<256x128xbf16>
    %cst_9 = arith.constant dense<0.000000e+00> : vector<128x128xf32>
    %11 = tpu.matmul %7, %10, %cst_9 {dimension_numbers = #tpu.dot_dimension_numbers<[1], [0], [0], [1], [0, 0, 1, 1], [], []>} : vector<128x256xbf16>, vector<256x128xbf16>, vector<128x128xf32> -> vector<128x128xf32>
    %12 = arith.addf %9, %11 : vector<128x128xf32>
    %c0_10 = arith.constant 0 : index
    %c0_11 = arith.constant 0 : index
    %13 = vector.load %arg5[%c0_10, %c0_11] : memref<1x128xf32, #tpu.memory_space<vmem>>, vector<1x128xf32>
    %14 = vector.broadcast %13 : vector<1x128xf32> to vector<128x128xf32>
    %15 = arith.addf %12, %14 : vector<128x128xf32>
    %cst_12 = arith.constant 0.000000e+00 : f32
    %16 = vector.broadcast %cst_12 : f32 to vector<128x128xf32>
    %17 = arith.maximumf %15, %16 : vector<128x128xf32>
    %18 = arith.truncf %17 : vector<128x128xf32> to vector<128x128xbf16>
    %c0_13 = arith.constant 0 : index
    %c0_14 = arith.constant 0 : index
    %19 = vector.load %arg6[%c0_13, %c0_14] : memref<128x128xbf16, #tpu.memory_space<vmem>>, vector<128x128xbf16>
    %cst_15 = arith.constant dense<0.000000e+00> : vector<128x128xf32>
    %20 = tpu.matmul %18, %19, %cst_15 {dimension_numbers = #tpu.dot_dimension_numbers<[1], [0], [0], [1], [0, 0, 1, 1], [], []>} : vector<128x128xbf16>, vector<128x128xbf16>, vector<128x128xf32> -> vector<128x128xf32>
    %c0_16 = arith.constant 0 : index
    %c0_17 = arith.constant 0 : index
    %21 = vector.load %arg7[%c0_16, %c0_17] : memref<1x128xf32, #tpu.memory_space<vmem>>, vector<1x128xf32>
    %22 = vector.broadcast %21 : vector<1x128xf32> to vector<128x128xf32>
    %23 = arith.addf %20, %22 : vector<128x128xf32>
    %cst_18 = arith.constant 0.000000e+00 : f32
    %24 = vector.broadcast %cst_18 : f32 to vector<128x128xf32>
    %25 = arith.maximumf %23, %24 : vector<128x128xf32>
    %26 = arith.truncf %25 : vector<128x128xf32> to vector<128x128xbf16>
    %c0_19 = arith.constant 0 : index
    %c0_20 = arith.constant 0 : index
    %27 = vector.load %arg8[%c0_19, %c0_20] : memref<128x128xbf16, #tpu.memory_space<vmem>>, vector<128x128xbf16>
    %cst_21 = arith.constant dense<0.000000e+00> : vector<128x128xf32>
    %28 = tpu.matmul %26, %27, %cst_21 {dimension_numbers = #tpu.dot_dimension_numbers<[1], [0], [0], [1], [0, 0, 1, 1], [], []>} : vector<128x128xbf16>, vector<128x128xbf16>, vector<128x128xf32> -> vector<128x128xf32>
    %c0_22 = arith.constant 0 : index
    %c0_23 = arith.constant 0 : index
    %29 = vector.load %arg9[%c0_22, %c0_23] : memref<1x128xf32, #tpu.memory_space<vmem>>, vector<1x128xf32>
    %30 = vector.broadcast %29 : vector<1x128xf32> to vector<128x128xf32>
    %31 = arith.addf %28, %30 : vector<128x128xf32>
    %c0_24 = arith.constant 0 : index
    %c0_25 = arith.constant 0 : index
    %32 = vector.load %arg10[%c0_24, %c0_25] : memref<128x128xf32, #tpu.memory_space<vmem>>, vector<128x128xf32>
    tpu.vector_store %arg10[%c0_24, %c0_25], %31 {strides = array<i32>} : memref<128x128xf32, #tpu.memory_space<vmem>>, vector<128x128xf32>,
    return
  }
  func.func @transform_0(%arg0: i32) -> (i32, i32) {
    %c0_i32 = arith.constant 0 : i32
    %c0_i32_0 = arith.constant 0 : i32
    return %arg0, %c0_i32 : i32, i32
  }
  func.func @transform_1(%arg0: i32) -> (i32, i32) {
    %c0_i32 = arith.constant 0 : i32
    %c0_i32_0 = arith.constant 0 : i32
    return %arg0, %c0_i32 : i32, i32
  }
  func.func @transform_2(%arg0: i32) -> (i32, i32) {
    %c0_i32 = arith.constant 0 : i32
    %c0_i32_0 = arith.constant 0 : i32
    %c0_i32_1 = arith.constant 0 : i32
    return %c0_i32, %c0_i32_0 : i32, i32
  }
  func.func @transform_3(%arg0: i32) -> (i32, i32) {
    %c0_i32 = arith.constant 0 : i32
    %c0_i32_0 = arith.constant 0 : i32
    %c0_i32_1 = arith.constant 0 : i32
    return %c0_i32, %c0_i32_0 : i32, i32
  }
  func.func @transform_4(%arg0: i32) -> (i32, i32) {
    %c0_i32 = arith.constant 0 : i32
    %c0_i32_0 = arith.constant 0 : i32
    %c0_i32_1 = arith.constant 0 : i32
    return %c0_i32, %c0_i32_0 : i32, i32
  }
  func.func @transform_5(%arg0: i32) -> (i32, i32) {
    %c0_i32 = arith.constant 0 : i32
    %c0_i32_0 = arith.constant 0 : i32
    %c0_i32_1 = arith.constant 0 : i32
    return %c0_i32, %c0_i32_0 : i32, i32
  }
  func.func @transform_6(%arg0: i32) -> (i32, i32) {
    %c0_i32 = arith.constant 0 : i32
    %c0_i32_0 = arith.constant 0 : i32
    %c0_i32_1 = arith.constant 0 : i32
    return %c0_i32, %c0_i32_0 : i32, i32
  }
  func.func @transform_7(%arg0: i32) -> (i32, i32) {
    %c0_i32 = arith.constant 0 : i32
    %c0_i32_0 = arith.constant 0 : i32
    %c0_i32_1 = arith.constant 0 : i32
    return %c0_i32, %c0_i32_0 : i32, i32
  }
  func.func @transform_8(%arg0: i32) -> (i32, i32) {
    %c0_i32 = arith.constant 0 : i32
    %c0_i32_0 = arith.constant 0 : i32
    %c0_i32_1 = arith.constant 0 : i32
    return %c0_i32, %c0_i32_0 : i32, i32
  }
  func.func @transform_9(%arg0: i32) -> (i32, i32) {
    %c0_i32 = arith.constant 0 : i32
    %c0_i32_0 = arith.constant 0 : i32
    return %arg0, %c0_i32 : i32, i32
  }
}

</mosaic_0001>

<bundles_post_ra>
// kernel: tpu_custom_call.1
= control target key start
LH: loop header
LB: loop body
LE: loop exit
PB: predicated region body
PF: predicated region fallthrough
CT: control target
= control target key end

     0   :  { %s2774_s0 = inlined_call_operand.hbm [shape: f32[256,128], index: 0, kind: input, shape index: {}]   ;;  %s2775_s1 = inlined_call_operand.hbm [shape: f32[256,256], index: 1, kind: input, shape index: {}]   ;;  %s2776_s2 = inlined_call_operand.hbm [shape: bf16[128,128], index: 2, kind: input, shape index: {}]   ;;  %s2777_s3 = inlined_call_operand.hbm [shape: bf16[256,128], index: 3, kind: input, shape index: {}]   ;;  %s2778_s4 = inlined_call_operand.vmem [shape: f32[1,128], index: 4, kind: input, shape index: {}]   ;;  %s2779_s5 = inlined_call_operand.hbm [shape: bf16[128,128], index: 5, kind: input, shape index: {}]   ;;  %s2780_s6 = inlined_call_operand.vmem [shape: f32[1,128], index: 6, kind: input, shape index: {}]   ;;  %s2781_s7 = inlined_call_operand.hbm [shape: bf16[128,128], index: 7, kind: input, shape index: {}]   ;;  %s2782_s8 = inlined_call_operand.vmem [shape: f32[1,128], index: 8, kind: input, shape index: {}]   ;;  %s2783_s9 = inlined_call_operand.hbm [shape: f32[256,128], index: 9, kind: output, shape index: {}]  }
   0x1   :  { %2790 = sst [smem:[#allocation22_spill]] %s2774_s0 }
   0x2   :  { %2791 = sst [smem:[#allocation23_spill]] %s2776_s2 }
   0x3   :  { %2792 = sst [smem:[#allocation24_spill]] %s2777_s3 }
   0x4   :  { %2793 = sst [smem:[#allocation25_spill]] %s2779_s5 }
   0x5   :  { %2794 = sst [smem:[#allocation26_spill]] %s2783_s9 }
   0x6   :  { %14 = vsyncpa [#allocation3], 0 }
   0x7   :  { %16 = vsyncpa [#allocation3 + $0x1], 0 }
   0x8   :  { %17 = vsyncpa [#allocation6], 0 }
   0x9   :  { %19 = vsyncpa [#allocation6 + $0x1], 0 }
   0xa   :  { %20 = vsyncpa [#allocation9], 0 }
   0xb   :  { %21 = vsyncpa [#allocation12], 0 }
   0xc   :  { %22 = vsyncpa [#allocation4], 0 }
   0xd   :  { %24 = vsyncpa [#allocation4 + $0x1], 0  ;;  %s2290_s30 = smov 0   ;;  %s2292_s10 = smov 0  }
   0xe   :  { %s2294_s11 = smov 0   ;;  %s2296_s12 = smov 0  }
   0xf LB: > { %2795 = sst [smem:[#allocation20_spill]] %s2211_s30  ;;  %s2311_s13 = sadd.s32 4294967295, %s2223_s12   ;;  %s2223_s12 = sphi %s2296_s12, %s2826_s12   ;;  %s2219_s11 = sphi %s2294_s11, %s2825_s11   ;;  %s2215_s10 = sphi %s2292_s10, %s2824_s10   ;;  %s2211_s30 = sphi %s2290_s30, %s2823_s30  }
  0x10   : > { %s1531_s14 = sadd.s32 4294967294, %s2223_s12   ;;  %p50_p0 = scmp.ne.s32.totalorder %s2215_s10, %s2211_s30 }
  0x11   : > { %p2784_p1 = scmp.eq.s32.totalorder %s2311_s13, 0  ;;  %p253_p3 = scmp.eq.s32.totalorder %s1531_s14, 1 }
  0x12   : > { %p1532_p5 = scmp.ge.s32.totalorder %s2223_s12, 1  ;;  %p260_p7 = scmp.lt.s32.totalorder %s2223_s12, 3 }
  0x13   : > { %p2320_p4 = por %p2784_p1, %p50_p0  ;;  %p2325_p6 = por %p253_p3, %p50_p0 }
  0x14   : > { %p2330_p8 = pnand %p1532_p5, %p260_p7  ;;  %s2225_s18 = smov [#allocation7]  }
  0x15   : > { %s2796_s15 = scalar_select %p2320_p4, 1, 0 }
  0x16   : > { %s2797_s16 = scalar_select %p2325_p6, 1, 0 }
  0x17   : > { %s2799_s17 = scalar_select %p2330_p8, 1, 0 }
  0x18   : > { %2798 = sst [smem:[#allocation21_spill]] %s2797_s16  ;;  %s272_s19 = sshll.u32 %s2225_s18, 4  ;;  %s2334_s19 = int_to_ptr.vmem [resolvable:$true] %s272_s19 }
  0x19   : > { %p1851_p9 = pneg %p2330_p8  ;;  %s2226_s21 = smov [#allocation8]  }
  0x1a   : > { %s285_s22 = sshll.u32 %s2226_s21, 4  ;;  %s2227_s23 = smov [#allocation10]   ;;  %s2345_s22 = int_to_ptr.vmem [resolvable:$true] %s285_s22 }
  0x1b   : > { %p2341_p11 = pnand %p1851_p9, %p2784_p1  ;;  %s2347_s24 = sshll.u32 %s2227_s23, 4  ;;  %s302_s24 = int_to_ptr.vmem [resolvable:$true] %s2347_s24 }
  0x1c   : > { %s2801_s2 = sld [smem:[#allocation23_spill]] }
  0x1d   : > { %p2357_p13 = pneg %p2341_p11 }
  0x22   : > { %s1969_s27 = scalar_lea.hbm %s2801_s2, 1024 }
  0x23   : > { %p1970_p12 = scmp.ne.s32.totalorder %s2801_s2, %s1969_s27  ;;  %p1976_p5 = scmp.lt.u32.totalorder %s1969_s27, %s2801_s2 }
  0x25   : > { %p1972_p0 = pnand %p2357_p13, %p1970_p12 }
  0x27   : > { %p1973_p3 = pneg %p1972_p0 }
  0x29   : > { %p1978_p7 = pnand %p1976_p5, %p1973_p3 }
  0x2b   : > { %1981 = shalt.err (!%p1978_p7)
}
  0x2c   : > { %s1982_s23 = scalar_lea.vmem %s2334_s19, 1024  ;;  %p1990_p2 = scmp.lt.s32.totalorder %s2334_s19, %s2334_s19 }
  0x2d   : > { %p1983_p9 = scmp.ne.s32.totalorder %s2334_s19, %s1982_s23  ;;  %p1991_p6 = scmp.lt.s32.totalorder %s1982_s23, %s1982_s23 }
  0x2f   : > { %p1985_p10 = pnand %p1983_p9, %p2357_p13  ;;  %p1992_p12 = por %p1991_p6, %p1990_p2 }
  0x31   : > { %p1986_p1 = pneg %p1985_p10 }
  0x33   : > { %p1993_p0 = pnand %p1992_p12, %p1986_p1 }
  0x35   : > { %1996 = shalt.err (!%p1993_p0)
}
  0x36   : > { %s2228_s25 = smov 64   ;;  %s2229_s26 = smov 4  }
  0x37   : > { %1854 = dma.hbm_to_vmem [thread:$0]  (!%p2341_p11), %s2801_s2, 1024, %s2334_s19, [#allocation6], %s2228_s25, %s2228_s25, %s2229_s26  }
  0x38   : > { %s2803_s3 = sld [smem:[#allocation24_spill]] }
  0x3e   : > { %s1997_s21 = scalar_lea.hbm %s2803_s3, 2048 }
  0x3f   : > { %p1998_p1 = scmp.ne.s32.totalorder %s2803_s3, %s1997_s21  ;;  %p2004_p10 = scmp.lt.u32.totalorder %s1997_s21, %s2803_s3 }
  0x41   : > { %p2000_p2 = pnand %p1998_p1, %p2357_p13 }
  0x43   : > { %p2001_p6 = pneg %p2000_p2 }
  0x45   : > { %p2006_p3 = pnand %p2004_p10, %p2001_p6 }
  0x47   : > { %2009 = shalt.err (!%p2006_p3)
}
  0x48   : > { %s2010_s19 = scalar_lea.vmem %s2345_s22, 2048  ;;  %p2018_p12 = scmp.lt.s32.totalorder %s2345_s22, %s2345_s22 }
  0x49   : > { %p2011_p5 = scmp.ne.s32.totalorder %s2345_s22, %s2010_s19  ;;  %p2019_p0 = scmp.lt.s32.totalorder %s2010_s19, %s2010_s19 }
  0x4b   : > { %p2013_p7 = pnand %p2011_p5, %p2357_p13  ;;  %p2020_p1 = por %p2019_p0, %p2018_p12 }
  0x4d   : > { %p2014_p9 = pneg %p2013_p7 }
  0x4f   : > { %p2021_p2 = pnand %p2020_p1, %p2014_p9 }
  0x51   : > { %2024 = shalt.err (!%p2021_p2)
}
  0x52   : > { %1857 = dma.hbm_to_vmem [thread:$0]  (!%p2341_p11), %s2803_s3, 2048, %s2345_s22, [#allocation9], %s2228_s25, %s2228_s25, %s2229_s26  }
  0x53   : > { %s2804_s5 = sld [smem:[#allocation25_spill]] }
  0x59   : > { %s2025_s28 = scalar_lea.hbm %s2804_s5, 1024 }
  0x5a   : > { %p2026_p6 = scmp.ne.s32.totalorder %s2804_s5, %s2025_s28  ;;  %p2032_p5 = scmp.lt.u32.totalorder %s2025_s28, %s2804_s5 }
  0x5c   : > { %p2028_p10 = pnand %p2026_p6, %p2357_p13 }
  0x5e   : > { %p2029_p3 = pneg %p2028_p10 }
  0x60   : > { %p2034_p7 = pnand %p2032_p5, %p2029_p3 }
  0x62   : > { %2037 = shalt.err (!%p2034_p7)
}
  0x63   : > { %s2038_s19 = scalar_lea.vmem %s302_s24, 1024  ;;  %p2046_p1 = scmp.lt.s32.totalorder %s302_s24, %s302_s24 }
  0x64   : > { %p2039_p9 = scmp.ne.s32.totalorder %s302_s24, %s2038_s19  ;;  %p2047_p2 = scmp.lt.s32.totalorder %s2038_s19, %s2038_s19 }
  0x66   : > { %p2041_p12 = pnand %p2039_p9, %p2357_p13  ;;  %p2048_p4 = por %p2047_p2, %p2046_p1 }
  0x68   : > { %p2042_p0 = pneg %p2041_p12 }
  0x6a   : > { %p2049_p8 = pnand %p2048_p4, %p2042_p0 }
  0x6c   : > { %2052 = shalt.err (!%p2049_p8)
}
  0x6d   : > { %1860 = dma.hbm_to_vmem [thread:$0]  (!%p2341_p11), %s2804_s5, 1024, %s302_s24, [#allocation9], %s2228_s25, %s2228_s25, %s2229_s26  }
  0x6e   : > { %s2230_s30 = smov [#allocation11]   ;;  %s2053_s29 = scalar_lea.hbm %s2781_s7, 1024 }
  0x6f   : > { %s317_s16 = sshll.u32 %s2230_s30, 4  ;;  %p2054_p4 = scmp.ne.s32.totalorder %s2781_s7, %s2053_s29  ;;  %s318_s16 = int_to_ptr.vmem [resolvable:$true] %s317_s16 }
  0x70   : > { %p2060_p10 = scmp.lt.u32.totalorder %s2053_s29, %s2781_s7 }
  0x71   : > { %p2056_p8 = pnand %p2054_p4, %p2357_p13 }
  0x73   : > { %p2057_p6 = pneg %p2056_p8 }
  0x75   : > { %p2062_p3 = pnand %p2060_p10, %p2057_p6 }
  0x77   : > { %2065 = shalt.err (!%p2062_p3)
}
  0x78   : > { %s2066_s24 = scalar_lea.vmem %s318_s16, 1024  ;;  %p2074_p12 = scmp.lt.s32.totalorder %s318_s16, %s318_s16 }
  0x79   : > { %p2067_p5 = scmp.ne.s32.totalorder %s318_s16, %s2066_s24  ;;  %p2075_p0 = scmp.lt.s32.totalorder %s2066_s24, %s2066_s24 }
  0x7b   : > { %p2069_p7 = pnand %p2067_p5, %p2357_p13  ;;  %p2076_p1 = por %p2075_p0, %p2074_p12 }
  0x7d   : > { %p2070_p9 = pneg %p2069_p7 }
  0x7f   : > { %p2077_p2 = pnand %p2076_p1, %p2070_p9 }
  0x81   : > { %2080 = shalt.err (!%p2077_p2)
}
  0x82   : > { %1863 = dma.hbm_to_vmem [thread:$0]  (!%p2341_p11), %s2781_s7, 1024, %s318_s16, [#allocation12], %s2228_s25, %s2228_s25, %s2229_s26  }
  0x83   : > { %s2451_s14 = sadd.s32 1, %s2223_s12   ;;  %s37_s20 = sadd.s32 1, %s2219_s11 }
  0x84   : > { %s34_s30 = ssub.s32 %s2223_s12, %s2451_s14  ;;  %p44_p13 = scmp.ne.s32.totalorder %s2219_s11, %s2215_s10 }
  0x85   : > { %p35_p4 = scmp.eq.s32.totalorder %s34_s30, 0  ;;  %p45_p8 = scmp.eq.s32.totalorder %s2223_s12, 0 }
  0x86   : > { %p2805_p6 = scmp.eq.s32.totalorder %s2311_s13, 1  ;;  %p1879_p3 = scmp.lt.s32.totalorder %s2223_s12, 2 }
  0x87   : > { %s2467_s28 = scalar_select %p35_p4, %s2219_s11, %s37_s20  }
  0x88   : > { %p2461_p10 = por %p2805_p6, %p44_p13  ;;  %p46_p5 = por %p45_p8, %p44_p13 }
  0x89   : > { %s2470_s29 = sand.u32 1, %s2219_s11   ;;  %s1601_s26 = sshll.u32 %s2223_s12, 11 }
  0x8a   : > { %s1538_s25 = sshll.u32 %s2470_s29, 7  ;;  %s2807_s0 = sld [smem:[#allocation22_spill]] }
  0x8b   : > { %s338_s23 = scalar_lea.vmem [#allocation2], %s1538_s25  ;;  %p2481_p11 = pnand %p1879_p3, %p46_p5 }
  0x8c   : > { %s345_s19 = sshll.u32 %s338_s23, 4  ;;  %s335_s9 = scalar_lea.sflag [#allocation3], %s2470_s29  ;;  %s2479_s19 = int_to_ptr.vmem [resolvable:$true] %s345_s19 }
  0x8d   : > { %p2083_p9 = pneg %p2481_p11 }
  0x90   : > { %s2477_s21 = scalar_lea.hbm %s2807_s0, %s1601_s26  ;;  %s2086_s26 = scalar_lea.hbm %s2807_s0, 4096 }
  0x91   : > { %s2081_s20 = scalar_lea.hbm %s2477_s21, 2048  ;;  %p2087_p1 = scmp.lt.u32.totalorder %s2477_s21, %s2807_s0 }
  0x92   : > { %p2082_p7 = scmp.ne.s32.totalorder %s2477_s21, %s2081_s20  ;;  %p2088_p2 = scmp.lt.u32.totalorder %s2086_s26, %s2081_s20 }
  0x93   : > { %p2090_p4 = scmp.lt.u32.totalorder %s2081_s20, %s2477_s21 }
  0x94   : > { %p2084_p12 = pnand %p2083_p9, %p2082_p7  ;;  %p2089_p13 = por %p2088_p2, %p2087_p1 }
  0x96   : > { %p2085_p0 = pneg %p2084_p12  ;;  %p2091_p8 = por %p2090_p4, %p2089_p13 }
  0x98   : > { %p2092_p6 = pnand %p2091_p8, %p2085_p0 }
  0x9a   : > { %2095 = shalt.err (!%p2092_p6)
}
  0x9b   : > { %s2096_s23 = scalar_lea.vmem %s2479_s19, 2048  ;;  %s2231_s30 = smov [#allocation2]  }
  0x9c   : > { %p2097_p3 = scmp.ne.s32.totalorder %s2479_s19, %s2096_s23  ;;  %s2101_s25 = sshll.u32 %s2231_s30, 4  ;;  %s2102_s25 = int_to_ptr.vmem [resolvable:$false] %s2101_s25 }
  0x9d   : > { %s2103_s16 = scalar_lea.vmem %s2102_s25, 4096  ;;  %p2104_p12 = scmp.lt.s32.totalorder %s2479_s19, %s2102_s25 }
  0x9e   : > { %p2099_p5 = pnand %p2097_p3, %p2083_p9  ;;  %p2105_p1 = scmp.lt.s32.totalorder %s2103_s16, %s2096_s23 }
  0xa0   : > { %p2100_p7 = pneg %p2099_p5  ;;  %p2106_p2 = por %p2105_p1, %p2104_p12 }
  0xa2   : > { %p2107_p13 = pnand %p2106_p2, %p2100_p7 }
  0xa4   : > { %2110 = shalt.err (!%p2107_p13)
}
  0xa5   : > { %s2232_s20 = smov 128   ;;  %s2233_s26 = smov 8  }
  0xa6   : > { %1867 = dma.hbm_to_vmem [thread:$0]  (!%p2481_p11), %s2477_s21, 2048, %s2479_s19, %s335_s9, %s2232_s20, %s2232_s20, %s2233_s26  }
  0xa7   : > { %s1541_s18 = sshll.u32 %s2470_s29, 8  ;;  %s1603_s30 = sshll.u32 %s2223_s12, 12 }
  0xa8   : > { %s2519_s16 = scalar_lea.hbm %s2775_s1, %s1603_s30  ;;  %s359_s22 = scalar_lea.vmem [#allocation5], %s1541_s18 }
  0xa9   : > { %s367_s0 = sshll.u32 %s359_s22, 4  ;;  %s2809_s2 = sand.u32 1, %s2223_s12   ;;  %s2521_s0 = int_to_ptr.vmem [resolvable:$true] %s367_s0 }
  0xaa   : > { %s2525_s3 = scalar_lea.sflag [#allocation6], %s2809_s2  ;;  %s2111_s5 = scalar_lea.hbm %s2519_s16, 4096 }
  0xab   : > { %p2112_p0 = scmp.ne.s32.totalorder %s2519_s16, %s2111_s5  ;;  %s2116_s19 = scalar_lea.hbm %s2775_s1, 8192 }
  0xac   : > { %p2117_p6 = scmp.lt.u32.totalorder %s2519_s16, %s2775_s1  ;;  %p2118_p3 = scmp.lt.u32.totalorder %s2116_s19, %s2111_s5 }
  0xad   : > { %p2114_p4 = pnand %p2112_p0, %p2083_p9  ;;  %p2120_p7 = scmp.lt.u32.totalorder %s2111_s5, %s2519_s16 }
  0xae   : > { %p2119_p5 = por %p2118_p3, %p2117_p6 }
  0xaf   : > { %p2115_p8 = pneg %p2114_p4 }
  0xb0   : > { %p2121_p12 = por %p2120_p7, %p2119_p5 }
  0xb2   : > { %p2122_p1 = pnand %p2121_p12, %p2115_p8 }
  0xb4   : > { %2125 = shalt.err (!%p2122_p1)
}
  0xb5   : > { %s2126_s2 = scalar_lea.vmem %s2521_s0, 4096  ;;  %s2234_s22 = smov [#allocation5]  }
  0xb6   : > { %p2127_p2 = scmp.ne.s32.totalorder %s2521_s0, %s2126_s2  ;;  %s2131_s26 = sshll.u32 %s2234_s22, 4  ;;  %s2132_s26 = int_to_ptr.vmem [resolvable:$false] %s2131_s26 }
  0xb7   : > { %s2133_s18 = scalar_lea.vmem %s2132_s26, 8192  ;;  %p2134_p4 = scmp.lt.s32.totalorder %s2521_s0, %s2132_s26 }
  0xb8   : > { %p2129_p13 = pnand %p2127_p2, %p2083_p9  ;;  %p2135_p6 = scmp.lt.s32.totalorder %s2133_s18, %s2126_s2 }
  0xba   : > { %p2130_p0 = pneg %p2129_p13  ;;  %p2136_p3 = por %p2135_p6, %p2134_p4 }
  0xbc   : > { %p2137_p5 = pnand %p2136_p3, %p2130_p0 }
  0xbe   : > { %2140 = shalt.err (!%p2137_p5)
}
  0xbf   : > { %s2235_s5 = smov 256   ;;  %s2236_s30 = smov 16  }
  0xc0   : > { %1870 = dma.hbm_to_vmem [thread:$0]  (!%p2481_p11), %s2519_s16, 4096, %s2521_s0, %s2525_s3, %s2235_s5, %s2235_s5, %s2236_s30  }
  0xc1   : > { %p2810_p9 = scmp.ne.s32.totalorder %s2799_s17, 0 }
  0xc2   : > { %s2554_s25 = sand.u32 (!%p2810_p9), 1, %s2215_s10   ;;  %p2811_p8 = scmp.ne.s32.totalorder (!%p2810_p9), %s2796_s15, 0 }
  0xc3   : > { %379 = sbr.rel (%p2810_p9) target bundleno = 984 (0x3d8), region = 56  ;;  %s1546_s23 = sshll.u32 (!%p2810_p9), %s2554_s25, 7 }
  0xc4   : > { %s382_s29 = scalar_lea.sflag (!%p2810_p9), [#allocation3], %s2554_s25  ;;  %s2560_s21 = scalar_lea.vmem (!%p2810_p9), [#allocation2], %s1546_s23 }
  0xca   : > { %2186 = dma.done.wait (%p2811_p8), %s382_s29, 2048  }
  0xcb   : > { %2188 = vsyncadd (%p2811_p8), %s382_s29, 4294965248  ;;  %s390_s0 = sand.u32 1, %s2311_s13   ;;  %s1547_s3 = sshll.u32 %s2554_s25, 8 }
  0xcc   : > { %s391_s17 = scalar_lea.sflag [#allocation6], %s390_s0  ;;  %s2568_s24 = scalar_lea.vmem [#allocation5], %s1547_s3 }
  0xcd   : > { %2190 = dma.done.wait (%p2811_p8), %s391_s17, 4096  }
  0xce   : > { %2192 = vsyncadd (%p2811_p8), %s391_s17, 4294963200  ;;  %p2812_p11 = scmp.eq.s32.totalorder %s2311_s13, 0 }
  0xd0   : > { %2194 = dma.done.wait (%p2812_p11), [#allocation6], 1024   ;;  %p2813_p7 = pmov %p2812_p11 }
  0xd2   : > { %2196 = vsyncadd (%p2813_p7), [#allocation6], 4294966272  ;;  %p2814_p12 = pmov %p2813_p7 }
  0xd3   : > { %p2815_p1 = pmov %p2813_p7 }
  0xd4   : > { %2198 = dma.done.wait (%p2814_p12), [#allocation9], 3072  }
  0xd5   : > { %2200 = vsyncadd (%p2815_p1), [#allocation9], 4294964224  ;;  %p2816_p2 = pmov %p2815_p1 }
  0xd6   : > { %p2817_p13 = pmov %p2815_p1 }
  0xd7   : > { %2202 = dma.done.wait (%p2816_p2), [#allocation12], 1024  }
  0xd8   : > { %2204 = vsyncadd (%p2817_p13), [#allocation12], 4294966272  ;;  %v1929_v0 = vld [vmem:[#allocation8 + $0x40] sm:$0xff]   ;;  %v1932_v3 = vld [vmem:[#allocation8 + $0x48] sm:$0xff]   ;;  %s2705_s22 = scalar_lea.vmem [#allocation13], %s1546_s23  ;;  %s1604_s26 = sshll.u32 %s2311_s13, 11 }
  0xd9   : > { %v1930_v1 = vld [vmem:[#allocation8] sm:$0xff]   ;;  %1605 = vmatprep.subr.bf16.mxu0 %v1929_v0  ;;  %v1933_v4 = vld [vmem:[#allocation8 + $0x8] sm:$0xff]   ;;  %v1935_v6 = vld [vmem:[#allocation8 + $0x50] sm:$0xff]   ;;  %s1397_s18 = sshll.u32 %s2705_s22, 4  ;;  %s2818_s23 = sld [smem:[#allocation26_spill]]  ;;  %s2727_s18 = int_to_ptr.vmem [resolvable:$true] %s1397_s18 }
  0xda   : > { %v1931_v2 = vld [vmem:[#allocation7] sm:$0xff]   ;;  %1606 = vmatpush3.bf16.msra.mxu0 %v1930_v1  ;;  %v1934_v5 = vld [vmem:[#allocation7 + $0x8] sm:$0xff]   ;;  %v1936_v7 = vld [vmem:[#allocation8 + $0x10] sm:$0xff]   ;;  %s1384_s13 = scalar_lea.sflag [#allocation4], %s2554_s25  ;;  %s2237_s0 = smov [#allocation13]  }
  0xdb   : > { %1717 = vmatprep.subr.bf16.mxu1 %v1931_v2  ;;  %1607 = vmatprep.subr.bf16.mxu0 %v1932_v3  ;;  %v1937_v8 = vld [vmem:[#allocation7 + $0x10] sm:$0xff]   ;;  %v1938_v9 = vld [vmem:[#allocation8 + $0x58] sm:$0xff]   ;;  %v1941_v12 = vld [vmem:[#allocation8 + $0x60] sm:$0xff]   ;;  %s2145_s3 = sshll.u32 %s2237_s0, 4  ;;  %s2146_s3 = int_to_ptr.vmem [resolvable:$false] %s2145_s3 }
  0xdc   : > { %1718 = vmatpush3.bf16.msra.mxu1 %v1931_v2  ;;  %v1939_v10 = vld [vmem:[#allocation8 + $0x18] sm:$0xff]   ;;  %v1943_v13 = vld [vmem:[#allocation7 + $0x20] sm:$0xff]   ;;  %v1944_v15 = vld [vmem:[#allocation8 + $0x68] sm:$0xff]   ;;  %s2147_s17 = scalar_lea.vmem %s2146_s3, 4096  ;;  %p2148_p3 = scmp.lt.s32.totalorder %s2727_s18, %s2146_s3 }
  0xdd   : > { %1719 = vmatprep.subr.bf16.mxu1 %v1934_v5  ;;  %v1940_v11 = vld [vmem:[#allocation7 + $0x18] sm:$0xff]   ;;  %v1942_v14 = vld [vmem:[#allocation8 + $0x20] sm:$0xff]   ;;  %v1946_v16 = vld [vmem:[#allocation7 + $0x28] sm:$0xff]  }
  0xde   : > { %1608 = vmatpush3.bf16.msra.mxu0 %v1933_v4  ;;  %v1945_v17 = vld [vmem:[#allocation8 + $0x28] sm:$0xff]   ;;  %v1947_v18 = vld [vmem:[#allocation8 + $0x70] sm:$0xff]   ;;  %v1950_v21 = vld [vmem:[#allocation8 + $0x78] sm:$0xff]  }
  0xdf   : > { %1609 = vmatprep.subr.bf16.mxu0 %v1935_v6  ;;  %v1948_v19 = vld [vmem:[#allocation8 + $0x30] sm:$0xff]   ;;  %v1952_v22 = vld [vmem:[#allocation7 + $0x38] sm:$0xff]   ;;  %v495_v23 = vld [vmem:[%s2568_s24 + $0x8] sm:$0xff]  ;;  %s2725_s29 = scalar_lea.hbm %s2818_s23, %s1604_s26 }
  0xe0   : > { %1720 = vmatpush3.bf16.msra.mxu1 %v1934_v5  ;;  %v1949_v20 = vld [vmem:[#allocation7 + $0x30] sm:$0xff]   ;;  %v497_v24 = vld [vmem:[%s2568_s24 + $0x18] sm:$0xff]  ;;  %v494_v25 = vld [vmem:[%s2568_s24] sm:$0xff]  ;;  %v527_v26 = vmax.f32 %v495_v23, 0.0 }
  0xe1   : > { %1721 = vmatprep.subr.bf16.mxu1 %v1937_v8  ;;  %v529_v27 = vmax.f32 %v497_v24, 0.0  ;;  %v496_v28 = vld [vmem:[%s2568_s24 + $0x10] sm:$0xff]  ;;  %v526_v29 = vmax.f32 %v494_v25, 0.0  ;;  %v454_v30 = vld [vmem:[%s2560_s21] sm:$0xff]  ;;  %v455_v31 = vld [vmem:[%s2560_s21 + $0x8] sm:$0xff] }
  0xe2   : > { %1610 = vmatpush3.bf16.msra.mxu0 %v1936_v7  ;;  %v528_v32 = vmax.f32 %v496_v28, 0.0  ;;  %v470_v33 = vmax.f32 %v454_v30, 0.0  ;;  %v471_v34 = vmax.f32 %v455_v31, 0.0  ;;  %v456_v35 = vld [vmem:[%s2560_s21 + $0x10] sm:$0xff]  ;;  %v457_v36 = vld [vmem:[%s2560_s21 + $0x18] sm:$0xff]  ;;  %v499_v37 = vld [vmem:[%s2568_s24 + $0x28] sm:$0xff] }
  0xe3   : > { %1611 = vmatprep.subr.bf16.mxu0 %v1938_v9  ;;  %v1951_v38 = vld [vmem:[#allocation8 + $0x38] sm:$0xff]   ;;  %v559_v39 = vpack.c.bf16 %v529_v27, %v527_v26  ;;  %v531_v41 = vmax.f32 %v499_v37, 0.0  ;;  %v472_v43 = vmax.f32 %v456_v35, 0.0  ;;  %v473_v44 = vmax.f32 %v457_v36, 0.0  ;;  %v458_v46 = vld [vmem:[%s2560_s21 + $0x20] sm:$0xff]  ;;  %v459_v47 = vld [vmem:[%s2560_s21 + $0x28] sm:$0xff] }
  0xe4   : > { %1722 = vmatpush3.bf16.msra.mxu1 %v1937_v8  ;;  %v501_v40 = vld [vmem:[%s2568_s24 + $0x38] sm:$0xff]  ;;  %v486_v42 = vpack.c.bf16 %v471_v34, %v470_v33  ;;  %v558_v48 = vpack.c.bf16 %v528_v32, %v526_v29  ;;  %v474_v49 = vmax.f32 %v458_v46, 0.0  ;;  %v498_v51 = vld [vmem:[%s2568_s24 + $0x20] sm:$0xff]  ;;  %v500_v52 = vld [vmem:[%s2568_s24 + $0x30] sm:$0xff]  ;;  %v475_v53 = vmax.f32 %v459_v47, 0.0 }
  0xe5   : > { %1723 = vmatprep.subr.bf16.mxu1 %v1940_v11  ;;  %v533_v45 = vmax.f32 %v501_v40, 0.0  ;;  %750 = vmatprep.mubr.bf16.mxu0 %v559_v39  ;;  %v487_v54 = vpack.c.bf16 %v473_v44, %v472_v43  ;;  %v503_v55 = vld [vmem:[%s2568_s24 + $0x48] sm:$0xff]  ;;  %v505_v56 = vld [vmem:[%s2568_s24 + $0x58] sm:$0xff]  ;;  %v460_v58 = vld [vmem:[%s2560_s21 + $0x30] sm:$0xff]  ;;  %v530_v60 = vmax.f32 %v498_v51, 0.0  ;;  %v532_v61 = vmax.f32 %v500_v52, 0.0 }
  0xe6   : > { %1612 = vmatpush3.bf16.msra.mxu0 %v1939_v10  ;;  %1733 = vmatprep.mubr.bf16.mxu1 %v486_v42  ;;  %v488_v57 = vpack.c.bf16 %v475_v53, %v474_v49  ;;  %v461_v59 = vld [vmem:[%s2560_s21 + $0x38] sm:$0xff]  ;;  %v462_v62 = vld [vmem:[%s2560_s21 + $0x40] sm:$0xff]  ;;  %v463_v63 = vld [vmem:[%s2560_s21 + $0x48] sm:$0xff]  ;;  %v535_v0 = vmax.f32 %v503_v55, 0.0  ;;  %v537_v1 = vmax.f32 %v505_v56, 0.0  ;;  %v476_v4 = vmax.f32 %v460_v58, 0.0 }
  0xe7   : > { %1613 = vmatprep.subr.bf16.mxu0 %v1941_v12  ;;  %v561_v50 = vpack.c.bf16 %v533_v45, %v531_v41  ;;  %v502_v2 = vld [vmem:[%s2568_s24 + $0x40] sm:$0xff]  ;;  %v504_v3 = vld [vmem:[%s2568_s24 + $0x50] sm:$0xff]  ;;  %v477_v5 = vmax.f32 %v461_v59, 0.0  ;;  %v507_v6 = vld [vmem:[%s2568_s24 + $0x68] sm:$0xff]  ;;  %v478_v10 = vmax.f32 %v462_v62, 0.0  ;;  %v560_v12 = vpack.c.bf16 %v532_v61, %v530_v60 }
  0xe8   : > { %1724 = vmatpush3.bf16.msra.mxu1 %v1940_v11  ;;  %v509_v7 = vld [vmem:[%s2568_s24 + $0x78] sm:$0xff]  ;;  %v506_v8 = vld [vmem:[%s2568_s24 + $0x60] sm:$0xff]  ;;  %v508_v9 = vld [vmem:[%s2568_s24 + $0x70] sm:$0xff]  ;;  %v479_v11 = vmax.f32 %v463_v63, 0.0 }
  0xe9   : > { %1725 = vmatprep.subr.bf16.mxu1 %v1943_v13  ;;  %v467_v23 = vld [vmem:[%s2560_s21 + $0x68] sm:$0xff]  ;;  %v489_v24 = vpack.c.bf16 %v477_v5, %v476_v4  ;;  %v538_v25 = vmax.f32 %v506_v8, 0.0  ;;  %v540_v26 = vmax.f32 %v508_v9, 0.0  ;;  %v1953_v31 = vld [vmem:[#allocation10] sm:$0xff]   ;;  %v1955_v36 = vld [vmem:[#allocation10 + $0x10] sm:$0xff]  }
  0xea   : > { %1614 = vmatpush3.bf16.msra.mxu0 %v1942_v14  ;;  %v511_v14 = vld [vmem:[%s2568_s24 + $0x88] sm:$0xff]  ;;  %v490_v29 = vpack.c.bf16 %v479_v11, %v478_v10  ;;  %v483_v34 = vmax.f32 %v467_v23, 0.0  ;;  %v468_v39 = vld [vmem:[%s2560_s21 + $0x70] sm:$0xff]  ;;  %v469_v40 = vld [vmem:[%s2560_s21 + $0x78] sm:$0xff] }
  0xeb   : > { %1615 = vmatprep.subr.bf16.mxu0 %v1944_v15  ;;  %v513_v15 = vld [vmem:[%s2568_s24 + $0x98] sm:$0xff]  ;;  %v543_v27 = vmax.f32 %v511_v14, 0.0  ;;  %v1954_v35 = vld [vmem:[#allocation10 + $0x8] sm:$0xff]   ;;  %v484_v43 = vmax.f32 %v468_v39, 0.0  ;;  %v485_v44 = vmax.f32 %v469_v40, 0.0  ;;  %v564_v45 = vpack.c.bf16 %v540_v26, %v538_v25  ;;  %v510_v47 = vld [vmem:[%s2568_s24 + $0x80] sm:$0xff] }
  0xec   : > { %1726 = vmatpush3.bf16.msra.mxu1 %v1943_v13  ;;  %v534_v13 = vmax.f32 %v502_v2, 0.0  ;;  %v545_v28 = vmax.f32 %v513_v15, 0.0  ;;  %v515_v49 = vld [vmem:[%s2568_s24 + $0xa8] sm:$0xff]  ;;  %v542_v52 = vmax.f32 %v510_v47, 0.0  ;;  %v514_v58 = vld [vmem:[%s2568_s24 + $0xa0] sm:$0xff]  ;;  %v516_v59 = vld [vmem:[%s2568_s24 + $0xb0] sm:$0xff] }
  0xed   : > { %1727 = vmatprep.subr.bf16.mxu1 %v1946_v16  ;;  %v493_v51 = vpack.c.bf16 %v485_v44, %v484_v43  ;;  %v519_v60 = vld [vmem:[%s2568_s24 + $0xc8] sm:$0xff]  ;;  %v521_v61 = vld [vmem:[%s2568_s24 + $0xd8] sm:$0xff]  ;;  %v546_v62 = vmax.f32 %v514_v58, 0.0  ;;  %v548_v63 = vmax.f32 %v516_v59, 0.0  ;;  %v518_v4 = vld [vmem:[%s2568_s24 + $0xc0] sm:$0xff] }
  0xee   : > { %1616 = vmatpush3.bf16.msra.mxu0 %v1945_v17  ;;  %v563_v17 = vpack.c.bf16 %v537_v1, %v535_v0  ;;  %v567_v46 = vpack.c.bf16 %v545_v28, %v543_v27  ;;  %v551_v0 = vmax.f32 %v519_v60, 0.0  ;;  %v553_v1 = vmax.f32 %v521_v61, 0.0  ;;  %v520_v5 = vld [vmem:[%s2568_s24 + $0xd0] sm:$0xff]  ;;  %v522_v14 = vld [vmem:[%s2568_s24 + $0xe0] sm:$0xff]  ;;  %v1960_v23 = vld [vmem:[#allocation10 + $0x38] sm:$0xff]  }
  0xef   : > { %1617 = vmatprep.subr.bf16.mxu0 %v1947_v18  ;;  %v536_v18 = vmax.f32 %v504_v3, 0.0  ;;  %v568_v2 = vpack.c.bf16 %v548_v63, %v546_v62  ;;  %v550_v8 = vmax.f32 %v518_v4, 0.0  ;;  %v552_v9 = vmax.f32 %v520_v5, 0.0  ;;  %v524_v15 = vld [vmem:[%s2568_s24 + $0xf0] sm:$0xff]  ;;  %v2636_v25 = vld [vmem:[#allocation11 + $0x8] sm:$0xff]   ;;  %v2646_v27 = vld [vmem:[#allocation11 + $0x18] sm:$0xff]  }
  0xf0   : > { %1728 = vmatpush3.bf16.msra.mxu1 %v1946_v16  ;;  %v464_v16 = vld [vmem:[%s2560_s21 + $0x50] sm:$0xff]  ;;  %v571_v3 = vpack.c.bf16 %v553_v1, %v551_v0  ;;  %v2650_v28 = vld [vmem:[#allocation11 + $0x20] sm:$0xff]  }
  0xf1   : > { %1729 = vmatprep.subr.bf16.mxu1 %v1949_v20  ;;  %v480_v30 = vmax.f32 %v464_v16, 0.0  ;;  %v562_v37 = vpack.c.bf16 %v536_v18, %v534_v13  ;;  %v554_v16 = vmax.f32 %v522_v14, 0.0  ;;  %v2642_v26 = vld [vmem:[#allocation11 + $0x10] sm:$0xff]  }
  0xf2   : > { %1618 = vmatpush3.bf16.msra.mxu0 %v1948_v19  ;;  %v539_v19 = vmax.f32 %v507_v6, 0.0  ;;  %v523_v6 = vld [vmem:[%s2568_s24 + $0xe8] sm:$0xff] }
  0xf3   : > { %1619 = vmatprep.subr.bf16.mxu0 %v1950_v21  ;;  %v465_v21 = vld [vmem:[%s2560_s21 + $0x58] sm:$0xff]  ;;  %v555_v10 = vmax.f32 %v523_v6, 0.0 }
  0xf4   : > { %1730 = vmatpush3.bf16.msra.mxu1 %v1949_v20  ;;  %v541_v20 = vmax.f32 %v509_v7, 0.0  ;;  %v481_v32 = vmax.f32 %v465_v21, 0.0  ;;  %v525_v7 = vld [vmem:[%s2568_s24 + $0xf8] sm:$0xff]  ;;  %v1958_v21 = vld [vmem:[#allocation10 + $0x28] sm:$0xff]  }
  0xf5   : > { %1731 = vmatprep.subr.bf16.mxu1 %v1952_v22  ;;  %v557_v11 = vmax.f32 %v525_v7, 0.0 }
  0xf6   : > { %1620 = vmatpush3.bf16.msra.mxu0 %v1951_v38  ;;  %v565_v38 = vpack.c.bf16 %v541_v20, %v539_v19  ;;  %v491_v41 = vpack.c.bf16 %v481_v32, %v480_v30  ;;  %v1956_v19 = vld [vmem:[#allocation10 + $0x18] sm:$0xff]   ;;  %v1957_v20 = vld [vmem:[#allocation10 + $0x20] sm:$0xff]  }
  0xf7   : > { %v573_v13 = vpack.c.bf16 %v557_v11, %v555_v10 }
  0xf8   : > { %1732 = vmatpush3.bf16.msra.mxu1 %v1952_v22  ;;  %v466_v22 = vld [vmem:[%s2560_s21 + $0x60] sm:$0xff]  ;;  %s2141_s21 = scalar_lea.vmem %s2727_s18, 2048 }
  0xf9   : > { %751 = vmatmul.mubr.bf16.vlgmr.msra.gmra.mrb[0].mxu0 %v558_v48  ;;  %v482_v33 = vmax.f32 %v466_v22, 0.0  ;;  %1749 = vmatprep.subr.bf16.mxu1 %v1953_v31  ;;  %v512_v48 = vld [vmem:[%s2568_s24 + $0x90] sm:$0xff]  ;;  %p2142_p0 = scmp.ne.s32.totalorder %s2727_s18, %s2141_s21  ;;  %p2149_p5 = scmp.lt.s32.totalorder %s2147_s17, %s2141_s21 }
  0xfa   : > { %758 = vmatprep.mubr.bf16.mxu0 %v561_v50  ;;  %v517_v50 = vld [vmem:[%s2568_s24 + $0xb8] sm:$0xff]  ;;  %v544_v53 = vmax.f32 %v512_v48, 0.0  ;;  %v1959_v22 = vld [vmem:[#allocation10 + $0x30] sm:$0xff]  }
  0xfb   : > { %1734 = vmatmul.mubr.bf16.vlgmr.msra.gmra.mrb[0].mxu1 %v487_v54  ;;  %v492_v42 = vpack.c.bf16 %v483_v34, %v482_v33  ;;  %v547_v54 = vmax.f32 %v515_v49, 0.0  ;;  %v549_v55 = vmax.f32 %v517_v50, 0.0  ;;  %p2143_p4 = pnand %p2142_p0, %p2461_p10  ;;  %p2150_p9 = por %p2149_p5, %p2148_p3 }
  0xfc   : > { %1737 = vmatprep.mubr.bf16.mxu1 %v488_v57  ;;  %1750 = vmatpush3.bf16.msra.mxu1 %v1953_v31  ;;  %v566_v56 = vpack.c.bf16 %v544_v53, %v542_v52 }
  0xfd   : > { %1751 = vmatprep.subr.bf16.mxu1 %v1954_v35  ;;  %v569_v57 = vpack.c.bf16 %v549_v55, %v547_v54  ;;  %p2144_p6 = pneg %p2143_p4 }
  0xff   : > { %p2151_p8 = pnand %p2150_p9, %p2144_p6 }
 0x100   : > { %1752 = vmatpush3.bf16.msra.mxu1 %v1954_v35 }
 0x101   : > { %759 = vmatmul.mubr.bf16.gmra.mrb[4].mxu0 %v560_v12  ;;  %1753 = vmatprep.subr.bf16.mxu1 %v1955_v36  ;;  %v570_v12 = vpack.c.bf16 %v552_v9, %v550_v8 }
 0x102   : > { %766 = vmatprep.mubr.bf16.mxu0 %v563_v17  ;;  %v556_v17 = vmax.f32 %v524_v15, 0.0 }
 0x103   : > { %1738 = vmatmul.mubr.bf16.gmra.mrb[4].mxu1 %v489_v24  ;;  %v2634_v24 = vld [vmem:[#allocation11] sm:$0xff]  }
 0x104   : > { %1741 = vmatprep.mubr.bf16.mxu1 %v490_v29  ;;  %1754 = vmatpush3.bf16.msra.mxu1 %v1955_v36  ;;  %v572_v18 = vpack.c.bf16 %v556_v17, %v554_v16  ;;  %v2654_v29 = vld [vmem:[#allocation11 + $0x28] sm:$0xff]  }
 0x105   : > { %1755 = vmatprep.subr.bf16.mxu1 %v1956_v19  ;;  %1781 = vmatprep.subr.bf16.mxu0 %v2634_v24 }
 0x106   : > { %1782 = vmatpush3.bf16.msra.mxu0 %v2634_v24 }
 0x107   : > { %1783 = vmatprep.subr.bf16.mxu0 %v2636_v25 }
 0x108   : > { %1756 = vmatpush3.bf16.msra.mxu1 %v1956_v19 }
 0x109   : > { %767 = vmatmul.mubr.bf16.gmra.mrb[8].mxu0 %v562_v37  ;;  %1757 = vmatprep.subr.bf16.mxu1 %v1957_v20  ;;  %v2662_v37 = vld [vmem:[%s2778_s4] ss:$0 sm:$0xff] }
 0x10a   : > { %774 = vmatprep.mubr.bf16.mxu0 %v565_v38  ;;  %1784 = vmatpush3.bf16.msra.mxu0 %v2636_v25 }
 0x10b   : > { %1742 = vmatmul.mubr.bf16.gmra.mrb[8].mxu1 %v491_v41  ;;  %1785 = vmatprep.subr.bf16.mxu0 %v2642_v26 }
 0x10c   : > { %1745 = vmatprep.mubr.bf16.mxu1 %v492_v42  ;;  %1758 = vmatpush3.bf16.msra.mxu1 %v1957_v20 }
 0x10d   : > { %1759 = vmatprep.subr.bf16.mxu1 %v1958_v21 }
 0x10e   : > { %1786 = vmatpush3.bf16.msra.mxu0 %v2642_v26 }
 0x10f   : > { %1787 = vmatprep.subr.bf16.mxu0 %v2646_v27 }
 0x110   : > { %1760 = vmatpush3.bf16.msra.mxu1 %v1958_v21 }
 0x111   : > { %775 = vmatmul.mubr.bf16.gmra.mrb[12].mxu0 %v564_v45  ;;  %1761 = vmatprep.subr.bf16.mxu1 %v1959_v22 }
 0x112   : > { %782 = vmatprep.mubr.bf16.mxu0 %v567_v46  ;;  %1788 = vmatpush3.bf16.msra.mxu0 %v2646_v27 }
 0x113   : > { %1746 = vmatmul.mubr.bf16.gmra.mrb[12].mxu1 %v493_v51  ;;  %1789 = vmatprep.subr.bf16.mxu0 %v2650_v28 }
 0x114   : > { %1762 = vmatpush3.bf16.msra.mxu1 %v1959_v22 }
 0x115   : > { %1763 = vmatprep.subr.bf16.mxu1 %v1960_v23 }
 0x116   : > { %1790 = vmatpush3.bf16.msra.mxu0 %v2650_v28 }
 0x117   : > { %1791 = vmatprep.subr.bf16.mxu0 %v2654_v29 }
 0x118   : > { %1764 = vmatpush3.bf16.msra.mxu1 %v1960_v23 }
 0x119   : > { %783 = vmatmul.mubr.bf16.gmra.mrb[16].mxu0 %v566_v56  ;;  %1813 = vmatprep.subr.bf16.mxu1 %v2634_v24 }
 0x11a   : > { %790 = vmatprep.mubr.bf16.mxu0 %v569_v57  ;;  %1792 = vmatpush3.bf16.msra.mxu0 %v2654_v29 }
 0x121   : > { %791 = vmatmul.mubr.bf16.gmra.mrb[20].mxu0 %v568_v2 }
 0x122   : > { %798 = vmatprep.mubr.bf16.mxu0 %v571_v3 }
 0x129   : > { %799 = vmatmul.mubr.bf16.gmra.mrb[24].mxu0 %v570_v12 }
 0x12a   : > { %806 = vmatprep.mubr.bf16.mxu0 %v573_v13 }
 0x131   : > { %807 = vmatmul.mubr.bf16.gmra.mrb[28].mxu0 %v572_v18 }
 0x1cc   : > { %v1621_v30 = vpop.f32.mrb[0].mxu0 }
 0x1cd   : > { %v1622_v31 = vpop.f32.mrb[1].mxu0 }
 0x1ce   : > { %v1623_v32 = vadd.f32 %v1622_v31, %v1621_v30  ;;  %v1624_v33 = vpop.f32.mrb[2].mxu0  ;;  %v1735_v34 = vpop.f32.mrb[0].mxu1 }
 0x1cf   : > { %v1625_v35 = vpop.f32.mrb[3].mxu0  ;;  %v897_v36 = vpop.f32.mrb[1].mxu1 }
 0x1d0   : > { %v1626_v38 = vadd.f32 %v1625_v35, %v1624_v33  ;;  %v898_v39 = vadd.f32 %v1623_v32, %v897_v36  ;;  %v1736_v40 = vpop.f32.mrb[2].mxu1 }
 0x1d1   : > { %v900_v41 = vpop.f32.mrb[3].mxu1 }
 0x1d2   : > { %v967_v42 = vadd.f32 %v2662_v37, %v898_v39  ;;  %v901_v43 = vadd.f32 %v1626_v38, %v900_v41 }
 0x1d4   : > { %v968_v44 = vadd.f32 %v2662_v37, %v901_v43  ;;  %v1627_v45 = vpop.f32.mrb[4].mxu0  ;;  %v983_v47 = vmax.f32 %v967_v42, 0.0 }
 0x1d5   : > { %v1628_v46 = vpop.f32.mrb[5].mxu0 }
 0x1d6   : > { %v984_v48 = vmax.f32 %v968_v44, 0.0  ;;  %v1629_v49 = vadd.f32 %v1628_v46, %v1627_v45  ;;  %v1630_v50 = vpop.f32.mrb[6].mxu0  ;;  %v1739_v51 = vpop.f32.mrb[4].mxu1 }
 0x1d7   : > { %v1631_v52 = vpop.f32.mrb[7].mxu0  ;;  %v913_v53 = vpop.f32.mrb[5].mxu1 }
 0x1d8   : > { %v906_v54 = vadd.f32 %v1735_v34, %v1629_v49  ;;  %v1632_v55 = vadd.f32 %v1631_v52, %v1630_v50  ;;  %v999_v56 = vpack.c.bf16 %v984_v48, %v983_v47  ;;  %v1740_v57 = vpop.f32.mrb[6].mxu1 }
 0x1d9   : > { %v916_v58 = vpop.f32.mrb[7].mxu1 }
 0x1da   : > { %v969_v59 = vadd.f32 %v2662_v37, %v906_v54  ;;  %v909_v60 = vadd.f32 %v1736_v40, %v1632_v55  ;;  %1765 = vmatprep.mubr.bf16.mxu1 %v999_v56 }
 0x1dc   : > { %v970_v61 = vadd.f32 %v2662_v37, %v909_v60  ;;  %v1633_v62 = vpop.f32.mrb[8].mxu0  ;;  %v985_v0 = vmax.f32 %v969_v59, 0.0 }
 0x1dd   : > { %v1634_v63 = vpop.f32.mrb[9].mxu0 }
 0x1de   : > { %v986_v1 = vmax.f32 %v970_v61, 0.0  ;;  %v1635_v2 = vadd.f32 %v1634_v63, %v1633_v62  ;;  %v1636_v3 = vpop.f32.mrb[10].mxu0  ;;  %v1743_v4 = vpop.f32.mrb[8].mxu1 }
 0x1df   : > { %v1637_v5 = vpop.f32.mrb[11].mxu0  ;;  %v929_v6 = vpop.f32.mrb[9].mxu1 }
 0x1e0   : > { %v1000_v7 = vpack.c.bf16 %v986_v1, %v985_v0  ;;  %v1638_v8 = vadd.f32 %v1637_v5, %v1636_v3  ;;  %v914_v9 = vadd.f32 %v1635_v2, %v913_v53  ;;  %v1744_v10 = vpop.f32.mrb[10].mxu1 }
 0x1e1   : > { %v932_v11 = vpop.f32.mrb[11].mxu1 }
 0x1e2   : > { %v971_v12 = vadd.f32 %v2662_v37, %v914_v9  ;;  %v917_v13 = vadd.f32 %v1638_v8, %v916_v58  ;;  %1766 = vmatmul.mubr.bf16.vlgmr.msra.gmra.mrb[16].mxu1 %v1000_v7 }
 0x1e3   : > { %1821 = vmatpush3.bf16.msra.mxu1 %v2634_v24 }
 0x1e4   : > { %v972_v14 = vadd.f32 %v2662_v37, %v917_v13  ;;  %v1639_v15 = vpop.f32.mrb[12].mxu0  ;;  %1814 = vmatprep.subr.bf16.mxu1 %v2636_v25  ;;  %v987_v17 = vmax.f32 %v971_v12, 0.0 }
 0x1e5   : > { %v1640_v16 = vpop.f32.mrb[13].mxu0 }
 0x1e6   : > { %v988_v18 = vmax.f32 %v972_v14, 0.0  ;;  %v1641_v19 = vadd.f32 %v1640_v16, %v1639_v15  ;;  %v1642_v20 = vpop.f32.mrb[14].mxu0  ;;  %v2672_v21 = vpop.f32.mrb[12].mxu1 }
 0x1e7   : > { %v1643_v22 = vpop.f32.mrb[15].mxu0  ;;  %v945_v23 = vpop.f32.mrb[13].mxu1  ;;  %1822 = vmatpush3.bf16.msra.mxu1 %v2636_v25 }
 0x1e8   : > { %v922_v30 = vadd.f32 %v1739_v51, %v1641_v19  ;;  %v1644_v31 = vadd.f32 %v1643_v22, %v1642_v20  ;;  %v1001_v32 = vpack.c.bf16 %v988_v18, %v987_v17  ;;  %v2675_v24 = vpop.f32.mrb[14].mxu1  ;;  %1815 = vmatprep.subr.bf16.mxu1 %v2642_v26 }
 0x1e9   : > { %v948_v33 = vpop.f32.mrb[15].mxu1 }
 0x1ea   : > { %v973_v34 = vadd.f32 %v2662_v37, %v922_v30  ;;  %v925_v35 = vadd.f32 %v1740_v57, %v1644_v31  ;;  %1769 = vmatprep.mubr.bf16.mxu1 %v1001_v32  ;;  %v1967_v31 = vld [vmem:[#allocation11 + $0x30] sm:$0xff]   ;;  %v1968_v32 = vld [vmem:[#allocation11 + $0x38] sm:$0xff]  }
 0x1eb   : > { %1823 = vmatpush3.bf16.msra.mxu1 %v2642_v26  ;;  %1793 = vmatprep.subr.bf16.mxu0 %v1967_v31 }
 0x1ec   : > { %v974_v36 = vadd.f32 %v2662_v37, %v925_v35  ;;  %v1645_v38 = vpop.f32.mrb[16].mxu0  ;;  %1816 = vmatprep.subr.bf16.mxu1 %v2646_v27  ;;  %v989_v39 = vmax.f32 %v973_v34, 0.0  ;;  %1794 = vmatpush3.bf16.msra.mxu0 %v1967_v31 }
 0x1ed   : > { %v1646_v25 = vpop.f32.mrb[17].mxu0  ;;  %1795 = vmatprep.subr.bf16.mxu0 %v1968_v32 }
 0x1ee   : > { %v990_v40 = vmax.f32 %v974_v36, 0.0  ;;  %v1647_v41 = vadd.f32 %v1646_v25, %v1645_v38  ;;  %v1648_v42 = vpop.f32.mrb[18].mxu0 }
 0x1ef   : > { %v1649_v43 = vpop.f32.mrb[19].mxu0  ;;  %1824 = vmatpush3.bf16.msra.mxu1 %v2646_v27 }
 0x1f0   : > { %v1650_v44 = vadd.f32 %v1649_v43, %v1648_v42  ;;  %v930_v45 = vadd.f32 %v1647_v41, %v929_v6  ;;  %v1002_v46 = vpack.c.bf16 %v990_v40, %v989_v39  ;;  %1817 = vmatprep.subr.bf16.mxu1 %v2650_v28  ;;  %1796 = vmatpush3.bf16.msra.mxu0 %v1968_v32 }
 0x1f2   : > { %v975_v26 = vadd.f32 %v2662_v37, %v930_v45  ;;  %v933_v47 = vadd.f32 %v1650_v44, %v932_v11  ;;  %1770 = vmatmul.mubr.bf16.gmra.mrb[20].mxu1 %v1002_v46 }
 0x1f3   : > { %1825 = vmatpush3.bf16.msra.mxu1 %v2650_v28 }
 0x1f4   : > { %v976_v48 = vadd.f32 %v2662_v37, %v933_v47  ;;  %v1651_v49 = vpop.f32.mrb[20].mxu0  ;;  %1818 = vmatprep.subr.bf16.mxu1 %v2654_v29  ;;  %v991_v51 = vmax.f32 %v975_v26, 0.0 }
 0x1f5   : > { %v1652_v50 = vpop.f32.mrb[21].mxu0 }
 0x1f6   : > { %v992_v52 = vmax.f32 %v976_v48, 0.0  ;;  %v1653_v27 = vadd.f32 %v1652_v50, %v1651_v49  ;;  %v1654_v53 = vpop.f32.mrb[22].mxu0 }
 0x1f7   : > { %v1655_v54 = vpop.f32.mrb[23].mxu0  ;;  %1826 = vmatpush3.bf16.msra.mxu1 %v2654_v29 }
 0x1f8   : > { %v938_v55 = vadd.f32 %v1743_v4, %v1653_v27  ;;  %v1656_v56 = vadd.f32 %v1655_v54, %v1654_v53  ;;  %v1003_v57 = vpack.c.bf16 %v992_v52, %v991_v51  ;;  %1819 = vmatprep.subr.bf16.mxu1 %v1967_v31 }
 0x1fa   : > { %v977_v58 = vadd.f32 %v2662_v37, %v938_v55  ;;  %v941_v59 = vadd.f32 %v1744_v10, %v1656_v56  ;;  %1773 = vmatprep.mubr.bf16.mxu1 %v1003_v57 }
 0x1fb   : > { %1827 = vmatpush3.bf16.msra.mxu1 %v1967_v31 }
 0x1fc   : > { %v978_v28 = vadd.f32 %v2662_v37, %v941_v59  ;;  %v1657_v60 = vpop.f32.mrb[24].mxu0  ;;  %v993_v62 = vmax.f32 %v977_v58, 0.0  ;;  %1820 = vmatprep.subr.bf16.mxu1 %v1968_v32 }
 0x1fd   : > { %v1658_v61 = vpop.f32.mrb[25].mxu0 }
 0x1fe   : > { %v994_v63 = vmax.f32 %v978_v28, 0.0  ;;  %v1659_v0 = vadd.f32 %v1658_v61, %v1657_v60  ;;  %v1660_v1 = vpop.f32.mrb[26].mxu0 }
 0x1ff   : > { %v1661_v2 = vpop.f32.mrb[27].mxu0  ;;  %1828 = vmatpush3.bf16.msra.mxu1 %v1968_v32 }
 0x200   : > { %v1662_v3 = vadd.f32 %v1661_v2, %v1660_v1  ;;  %v946_v5 = vadd.f32 %v1659_v0, %v945_v23  ;;  %v1004_v6 = vpack.c.bf16 %v994_v63, %v993_v62 }
 0x202   : > { %v979_v29 = vadd.f32 %v2662_v37, %v946_v5  ;;  %v949_v4 = vadd.f32 %v1662_v3, %v948_v33  ;;  %1774 = vmatmul.mubr.bf16.gmra.mrb[24].mxu1 %v1004_v6 }
 0x204   : > { %v980_v7 = vadd.f32 %v2662_v37, %v949_v4  ;;  %v1663_v8 = vpop.f32.mrb[28].mxu0  ;;  %v995_v10 = vmax.f32 %v979_v29, 0.0 }
 0x205   : > { %v1664_v9 = vpop.f32.mrb[29].mxu0 }
 0x206   : > { %v996_v11 = vmax.f32 %v980_v7, 0.0  ;;  %v1665_v12 = vadd.f32 %v1664_v9, %v1663_v8  ;;  %v1666_v13 = vpop.f32.mrb[30].mxu0 }
 0x207   : > { %v1667_v14 = vpop.f32.mrb[31].mxu0 }
 0x208   : > { %v954_v15 = vadd.f32 %v2672_v21, %v1665_v12  ;;  %v1668_v16 = vadd.f32 %v1667_v14, %v1666_v13  ;;  %v1005_v17 = vpack.c.bf16 %v996_v11, %v995_v10  ;;  %v1578_v21 = vld [vmem:[%s2780_s6] ss:$0 sm:$0xff] }
 0x20a   : > { %v981_v18 = vadd.f32 %v2662_v37, %v954_v15  ;;  %v957_v19 = vadd.f32 %v2675_v24, %v1668_v16  ;;  %1777 = vmatprep.mubr.bf16.mxu1 %v1005_v17 }
 0x20c   : > { %v982_v20 = vadd.f32 %v2662_v37, %v957_v19  ;;  %v997_v22 = vmax.f32 %v981_v18, 0.0  ;;  %v1587_v19 = vld [vmem:[%s2782_s8] ss:$0 sm:$0xff] }
 0x20e   : > { %v998_v23 = vmax.f32 %v982_v20, 0.0 }
 0x210   : > { %v1006_v30 = vpack.c.bf16 %v998_v23, %v997_v22 }
 0x212   : > { %1778 = vmatmul.mubr.bf16.gmra.mrb[28].mxu1 %v1006_v30 }
 0x2b5   : > { %v1767_v24 = vpop.f32.mrb[16].mxu1 }
 0x2b6   : > { %v1121_v37 = vadd.f32 %v1767_v24, %v1578_v21  ;;  %v1112_v33 = vpop.f32.mrb[17].mxu1 }
 0x2b7   : > { %v1113_v34 = vadd.f32 %v1578_v21, %v1112_v33  ;;  %v1768_v35 = vpop.f32.mrb[18].mxu1 }
 0x2b8   : > { %v1124_v36 = vadd.f32 %v1768_v35, %v1578_v21  ;;  %v1115_v38 = vpop.f32.mrb[19].mxu1  ;;  %v1177_v39 = vmax.f32 %v1121_v37, 0.0 }
 0x2b9   : > { %v1116_v25 = vadd.f32 %v1578_v21, %v1115_v38  ;;  %v1175_v41 = vmax.f32 %v1113_v34, 0.0 }
 0x2ba   : > { %v1178_v40 = vmax.f32 %v1124_v36, 0.0 }
 0x2bb   : > { %v1176_v42 = vmax.f32 %v1116_v25, 0.0 }
 0x2bc   : > { %v1192_v43 = vpack.c.bf16 %v1178_v40, %v1177_v39 }
 0x2bd   : > { %v1191_v44 = vpack.c.bf16 %v1176_v42, %v1175_v41 }
 0x2bf   : > { %1797 = vmatprep.mubr.bf16.mxu0 %v1191_v44 }
 0x2c0   : > { %1798 = vmatmul.mubr.bf16.vlgmr.msra.gmra.mrb[32].mxu0 %v1192_v43 }
 0x2c5   : > { %v1771_v45 = vpop.f32.mrb[20].mxu1 }
 0x2c6   : > { %v1137_v46 = vadd.f32 %v1771_v45, %v1578_v21  ;;  %v1128_v26 = vpop.f32.mrb[21].mxu1 }
 0x2c7   : > { %v1129_v47 = vadd.f32 %v1578_v21, %v1128_v26  ;;  %v1772_v48 = vpop.f32.mrb[22].mxu1 }
 0x2c8   : > { %v1140_v49 = vadd.f32 %v1772_v48, %v1578_v21  ;;  %v1131_v50 = vpop.f32.mrb[23].mxu1  ;;  %v1181_v52 = vmax.f32 %v1137_v46, 0.0 }
 0x2c9   : > { %v1132_v51 = vadd.f32 %v1578_v21, %v1131_v50  ;;  %v1179_v53 = vmax.f32 %v1129_v47, 0.0 }
 0x2ca   : > { %v1182_v27 = vmax.f32 %v1140_v49, 0.0 }
 0x2cb   : > { %v1180_v54 = vmax.f32 %v1132_v51, 0.0 }
 0x2cc   : > { %v1194_v55 = vpack.c.bf16 %v1182_v27, %v1181_v52 }
 0x2cd   : > { %v1193_v56 = vpack.c.bf16 %v1180_v54, %v1179_v53 }
 0x2cf   : > { %1801 = vmatprep.mubr.bf16.mxu0 %v1193_v56 }
 0x2d0   : > { %1802 = vmatmul.mubr.bf16.gmra.mrb[36].mxu0 %v1194_v55 }
 0x2d5   : > { %v1775_v57 = vpop.f32.mrb[24].mxu1 }
 0x2d6   : > { %v1153_v58 = vadd.f32 %v1775_v57, %v1578_v21  ;;  %v1144_v59 = vpop.f32.mrb[25].mxu1 }
 0x2d7   : > { %v1145_v28 = vadd.f32 %v1578_v21, %v1144_v59  ;;  %v1776_v60 = vpop.f32.mrb[26].mxu1 }
 0x2d8   : > { %v1156_v61 = vadd.f32 %v1776_v60, %v1578_v21  ;;  %v1147_v62 = vpop.f32.mrb[27].mxu1  ;;  %v1185_v0 = vmax.f32 %v1153_v58, 0.0 }
 0x2d9   : > { %v1148_v63 = vadd.f32 %v1578_v21, %v1147_v62  ;;  %v1183_v2 = vmax.f32 %v1145_v28, 0.0 }
 0x2da   : > { %v1186_v1 = vmax.f32 %v1156_v61, 0.0 }
 0x2db   : > { %v1184_v3 = vmax.f32 %v1148_v63, 0.0 }
 0x2dc   : > { %v1196_v5 = vpack.c.bf16 %v1186_v1, %v1185_v0 }
 0x2dd   : > { %v1195_v6 = vpack.c.bf16 %v1184_v3, %v1183_v2 }
 0x2df   : > { %1805 = vmatprep.mubr.bf16.mxu1 %v1195_v6 }
 0x2e0   : > { %1806 = vmatmul.mubr.bf16.vlgmr.msra.gmra.mrb[32].mxu1 %v1196_v5 }
 0x2e5   : > { %v1779_v29 = vpop.f32.mrb[28].mxu1 }
 0x2e6   : > { %v1169_v4 = vadd.f32 %v1779_v29, %v1578_v21  ;;  %v1160_v7 = vpop.f32.mrb[29].mxu1 }
 0x2e7   : > { %v1161_v8 = vadd.f32 %v1578_v21, %v1160_v7  ;;  %v1780_v9 = vpop.f32.mrb[30].mxu1 }
 0x2e8   : > { %v1172_v10 = vadd.f32 %v1780_v9, %v1578_v21  ;;  %v1163_v11 = vpop.f32.mrb[31].mxu1  ;;  %v1189_v13 = vmax.f32 %v1169_v4, 0.0 }
 0x2e9   : > { %v1164_v12 = vadd.f32 %v1578_v21, %v1163_v11  ;;  %v1187_v15 = vmax.f32 %v1161_v8, 0.0 }
 0x2ea   : > { %v1190_v14 = vmax.f32 %v1172_v10, 0.0 }
 0x2eb   : > { %v1188_v16 = vmax.f32 %v1164_v12, 0.0 }
 0x2ec   : > { %v1198_v17 = vpack.c.bf16 %v1190_v14, %v1189_v13 }
 0x2ed   : > { %v1197_v18 = vpack.c.bf16 %v1188_v16, %v1187_v15 }
 0x2ef   : > { %1809 = vmatprep.mubr.bf16.mxu1 %v1197_v18 }
 0x2f0   : > { %1810 = vmatmul.mubr.bf16.gmra.mrb[36].mxu1 %v1198_v17 }
 0x393   : > { %v1799_v20 = vpop.f32.mrb[32].mxu0 }
 0x394   : > { %v1313_v22 = vadd.f32 %v1799_v20, %v1587_v19  ;;  %v1304_v23 = vpop.f32.mrb[33].mxu0 }
 0x395   : > { %v1305_v30 = vadd.f32 %v1587_v19, %v1304_v23  ;;  %v1800_v31 = vpop.f32.mrb[34].mxu0 }
 0x396   : > { %1369 = vst [vmem:[%s2705_s22 + $0x10] sm:$0xff] %v1313_v22  ;;  %v1316_v32 = vadd.f32 %v1800_v31, %v1587_v19  ;;  %v1307_v21 = vpop.f32.mrb[35].mxu0 }
 0x397   : > { %1367 = vst [vmem:[%s2705_s22] sm:$0xff] %v1305_v30  ;;  %v1308_v24 = vadd.f32 %v1587_v19, %v1307_v21 }
 0x398   : > { %1370 = vst [vmem:[%s2705_s22 + $0x18] sm:$0xff] %v1316_v32 }
 0x399   : > { %1368 = vst [vmem:[%s2705_s22 + $0x8] sm:$0xff] %v1308_v24 }
 0x3a3   : > { %v1803_v37 = vpop.f32.mrb[36].mxu0 }
 0x3a4   : > { %v1329_v33 = vadd.f32 %v1803_v37, %v1587_v19  ;;  %v1320_v34 = vpop.f32.mrb[37].mxu0 }
 0x3a5   : > { %v1321_v35 = vadd.f32 %v1587_v19, %v1320_v34  ;;  %v1804_v36 = vpop.f32.mrb[38].mxu0 }
 0x3a6   : > { %1373 = vst [vmem:[%s2705_s22 + $0x30] sm:$0xff] %v1329_v33  ;;  %v1332_v38 = vadd.f32 %v1804_v36, %v1587_v19  ;;  %v1323_v25 = vpop.f32.mrb[39].mxu0 }
 0x3a7   : > { %1371 = vst [vmem:[%s2705_s22 + $0x20] sm:$0xff] %v1321_v35  ;;  %v1324_v39 = vadd.f32 %v1587_v19, %v1323_v25 }
 0x3a8   : > { %1374 = vst [vmem:[%s2705_s22 + $0x38] sm:$0xff] %v1332_v38 }
 0x3a9   : > { %1372 = vst [vmem:[%s2705_s22 + $0x28] sm:$0xff] %v1324_v39 }
 0x3b3   : > { %v1807_v40 = vpop.f32.mrb[32].mxu1 }
 0x3b4   : > { %v1345_v41 = vadd.f32 %v1807_v40, %v1587_v19  ;;  %v1336_v42 = vpop.f32.mrb[33].mxu1 }
 0x3b5   : > { %v1337_v43 = vadd.f32 %v1587_v19, %v1336_v42  ;;  %v1808_v44 = vpop.f32.mrb[34].mxu1 }
 0x3b6   : > { %1377 = vst [vmem:[%s2705_s22 + $0x50] sm:$0xff] %v1345_v41  ;;  %v1348_v45 = vadd.f32 %v1808_v44, %v1587_v19  ;;  %v1339_v46 = vpop.f32.mrb[35].mxu1 }
 0x3b7   : > { %1375 = vst [vmem:[%s2705_s22 + $0x40] sm:$0xff] %v1337_v43  ;;  %v1340_v26 = vadd.f32 %v1587_v19, %v1339_v46 }
 0x3b8   : > { %1378 = vst [vmem:[%s2705_s22 + $0x58] sm:$0xff] %v1348_v45 }
 0x3b9   : > { %1376 = vst [vmem:[%s2705_s22 + $0x48] sm:$0xff] %v1340_v26 }
 0x3c3   : > { %v1811_v47 = vpop.f32.mrb[36].mxu1 }
 0x3c4   : > { %v1361_v48 = vadd.f32 %v1811_v47, %v1587_v19  ;;  %v1352_v49 = vpop.f32.mrb[37].mxu1 }
 0x3c5   : > { %v1353_v50 = vadd.f32 %v1587_v19, %v1352_v49  ;;  %v1812_v51 = vpop.f32.mrb[38].mxu1 }
 0x3c6   : > { %1381 = vst [vmem:[%s2705_s22 + $0x70] sm:$0xff] %v1361_v48  ;;  %v1364_v52 = vadd.f32 %v1812_v51, %v1587_v19  ;;  %v1355_v27 = vpop.f32.mrb[39].mxu1 }
 0x3c7   : > { %1379 = vst [vmem:[%s2705_s22 + $0x60] sm:$0xff] %v1353_v50  ;;  %v1356_v53 = vadd.f32 %v1587_v19, %v1355_v27 }
 0x3c8   : > { %1382 = vst [vmem:[%s2705_s22 + $0x78] sm:$0xff] %v1364_v52 }
 0x3c9   : > { %1380 = vst [vmem:[%s2705_s22 + $0x68] sm:$0xff] %v1356_v53 }
 0x3ca   : > { %2154 = shalt.err (!%p2151_p8)
}
 0x3cb   : > { %s2155_s24 = scalar_lea.hbm %s2725_s29, 2048  ;;  %s2159_s19 = scalar_lea.hbm %s2818_s23, 4096 }
 0x3cc   : > { %p2156_p11 = scmp.ne.s32.totalorder %s2725_s29, %s2155_s24  ;;  %p2160_p1 = scmp.lt.u32.totalorder %s2725_s29, %s2818_s23 }
 0x3cd   : > { %p2161_p2 = scmp.lt.u32.totalorder %s2159_s19, %s2155_s24  ;;  %p2163_p0 = scmp.lt.u32.totalorder %s2155_s24, %s2725_s29 }
 0x3ce   : > { %p2157_p7 = pnand %p2156_p11, %p2461_p10 }
 0x3cf   : > { %p2162_p13 = por %p2161_p2, %p2160_p1 }
 0x3d0   : > { %p2158_p12 = pneg %p2157_p7 }
 0x3d1   : > { %p2164_p4 = por %p2163_p0, %p2162_p13 }
 0x3d3   : > { %p2165_p6 = pnand %p2164_p4, %p2158_p12 }
 0x3d5   : > { %2168 = shalt.err (!%p2165_p6)
}
 0x3d6   : > { %s2238_s2 = smov 128   ;;  %s2239_s22 = smov 8  }
 0x3d7   : > { %1849 = dma.vmem_to_hbm [thread:$0]  (%p2461_p10), %s2727_s18, 2048, %s2725_s29, %s1384_s13, %s2238_s2, %s2238_s2, %s2239_s22  }
 0x3d8 PF: > { %s2819_s26 = sld [smem:[#allocation20_spill]]  ;;  %s2820_s5 = sld [smem:[#allocation21_spill]] }
 0x3d9   : > { %p2822_p5 = scmp.ge.s32.totalorder %s2223_s12, 2 }
 0x3de   : > { %s1412_s30 = sand.u32 1, %s2819_s26   ;;  %p2821_p3 = scmp.ne.s32.totalorder %s2820_s5, 0 }
 0x3df   : > { %s1413_s21 = scalar_lea.sflag [#allocation4], %s1412_s30 }
 0x3e0   : > { %p1872_p9 = pnand %p2822_p5, %p2821_p3 }
 0x3e2   : > { %2206 = dma.done.wait (!%p1872_p9), %s1413_s21, 2048  }
 0x3e3   : > { %2208 = vsyncadd (!%p1872_p9), %s1413_s21, 4294965248  ;;  %p27_p8 = scmp.ge.s32.totalorder %s2451_s14, 4   ;;  %s2823_s30 = smov %s2215_s10 }
 0x3e4   : > { %s2824_s10 = smov %s2219_s11  ;;  %s2825_s11 = smov %s2467_s28 }
 0x3e5   : > { %s2826_s12 = smov %s2451_s14  ;;  %29 = sbr.rel (!%p27_p8) target bundleno = 15 (0xf), region = 130 }
 0x3ec   :  { %1418 = vsyncpa [#allocation3], 1 }
 0x3ed   :  { %1420 = vsyncpa [#allocation3 + $0x1], 1 }
 0x3ee   :  { %1421 = vsyncpa [#allocation6], 1 }
 0x3ef   :  { %1423 = vsyncpa [#allocation6 + $0x1], 1 }
 0x3f0   :  { %1424 = vsyncpa [#allocation9], 1 }
 0x3f1   :  { %1425 = vsyncpa [#allocation12], 1 }
 0x3f2   :  { %1426 = vsyncpa [#allocation4], 1 }
 0x3f3   :  { %1428 = vsyncpa [#allocation4 + $0x1], 1 }

</bundles_post_ra>
